<compile_context>
chip_gen: v7x
topology: tpu7x:2x2x1
jax: 0.10.0
libtpu: 0.0.40
codegen_flags: <defaults>
</compile_context>

<pallas_src>
import functools

import jax
import jax.numpy as jnp
from jax.experimental import pallas as pl
from jax.experimental.pallas import tpu as pltpu

NEG_SLOPE = 0.01  # torch.nn.LeakyReLU default
LANE = 128


def _leaky_relu(x):
    return jnp.where(x >= 0, x, NEG_SLOPE * x)


def _round_up(x, m):
    return ((x + m - 1) // m) * m


def _pad2(a, rows, cols):
    r, c = a.shape
    return jnp.pad(a, ((0, rows - r), (0, cols - c)))


def _vmem_limit_bytes():
    # Per-generation scoped-VMEM limit with headroom for compiler scratch:
    # ~54 MiB on v7x (64 MiB physical), ~109 MiB on v5e/v6e (128 MiB physical).
    cap = 64 * 2**20
    try:
        cap = max(int(pltpu.get_tpu_info().vmem_capacity_bytes), cap)
    except Exception:
        pass
    return int(min(cap * 0.85, cap - (8 << 20)))


# --------------------------- fused single kernel --------------------------- #

def _fused_gcn_kernel(n_taps, ch_p,
                      x_ref, s_ref, w_in_ref, b_in_ref,
                      w_l_ref, b_l_ref, w_out_ref, b_out_ref,
                      o_ref, h_ref):
    l = pl.program_id(0)

    # readin MLP (plain_last=False -> activation), only on the first grid step
    @pl.when(l == 0)
    def _readin():
        h_ref[...] = _leaky_relu(
            jnp.dot(x_ref[...], w_in_ref[...],
                    preferred_element_type=jnp.float32) + b_in_ref[...])

    # RES+ residual block for layer l: act -> polynomial graph filter -> add.
    # K+1 accumulating dots against static row-slices of the stacked weight
    # slab (no concat buffer); hop intermediates stay bf16 in registers/VMEM.
    h = h_ref[...]
    s = s_ref[...]
    y = _leaky_relu(h).astype(jnp.bfloat16)
    z = jnp.dot(y, w_l_ref[0:ch_p, :],
                preferred_element_type=jnp.float32) + b_l_ref[...]
    for k in range(1, n_taps + 1):
        y = jnp.dot(s, y, preferred_element_type=jnp.float32).astype(jnp.bfloat16)
        z = z + jnp.dot(y, w_l_ref[k * ch_p:(k + 1) * ch_p, :],
                        preferred_element_type=jnp.float32)
    h_ref[...] = h + z

    # readout MLP (plain_last=True -> no activation), only on the last step
    @pl.when(l == pl.num_programs(0) - 1)
    def _readout():
        o_ref[...] = (jnp.dot(h_ref[...].astype(jnp.bfloat16), w_out_ref[...],
                              preferred_element_type=jnp.float32)
                      + b_out_ref[...])


def _gcn_fused(x_p, s_p, w_in, b_in, w_stack, b_stack, w_out, b_out,
               *, n_layers, n_taps, n_p, ch_p, co_p, vmem_limit):
    wk = (n_taps + 1) * ch_p

    def full(shape):
        return pl.BlockSpec(shape, lambda l: (0,) * len(shape))

    return pl.pallas_call(
        functools.partial(_fused_gcn_kernel, n_taps, ch_p),
        grid=(n_layers,),
        in_specs=[
            full(x_p.shape),                                   # x (resident)
            full(s_p.shape),                                   # S (resident)
            full(w_in.shape),
            full(b_in.shape),
            pl.BlockSpec((None, wk, ch_p), lambda l: (l, 0, 0)),   # layer slab
            pl.BlockSpec((None, 1, ch_p), lambda l: (l, 0, 0)),    # layer bias
            full(w_out.shape),
            full(b_out.shape),
        ],
        out_specs=pl.BlockSpec((n_p, co_p), lambda l: (0, 0)),
        out_shape=jax.ShapeDtypeStruct((n_p, co_p), jnp.float32),
        scratch_shapes=[pltpu.VMEM((n_p, ch_p), jnp.float32)],     # resident h
        compiler_params=pltpu.CompilerParams(
            dimension_semantics=("arbitrary",),
            vmem_limit_bytes=vmem_limit),
    )(x_p, s_p, w_in, b_in, w_stack, b_stack, w_out, b_out)


# ------------------------- tiled large-graph path -------------------------- #

def _linear_kernel(apply_act, x_ref, w_ref, b_ref, o_ref):
    y = jnp.dot(x_ref[...].astype(jnp.bfloat16), w_ref[...],
                preferred_element_type=jnp.float32) + b_ref[...]
    o_ref[...] = _leaky_relu(y) if apply_act else y


def _zinit_kernel(h_ref, w0_ref, b_ref, y0_ref, z_ref):
    # Tap 0 + residual fold:  y0 = act(h);  z = h + y0 @ W0 + b_sum
    h = h_ref[...]
    y0 = _leaky_relu(h).astype(jnp.bfloat16)
    y0_ref[...] = y0
    z_ref[...] = h + jnp.dot(y0, w0_ref[...],
                             preferred_element_type=jnp.float32) + b_ref[...]


def _hop_kernel(s_ref, y_ref, w_ref, zin_ref, yout_ref, zout_ref, acc_ref):
    # One graph-shift hop with the tap matmul folded in:
    #   y_k = S @ y_{k-1}   (K-tiled over S columns, f32 accumulator)
    #   z  += y_k @ W_k      (accumulated in place; z aliased input->output)
    j = pl.program_id(1)

    @pl.when(j == 0)
    def _():
        acc_ref[...] = jnp.zeros_like(acc_ref)

    acc_ref[...] += jnp.dot(s_ref[...].astype(jnp.bfloat16), y_ref[...],
                            preferred_element_type=jnp.float32)

    @pl.when(j == pl.num_programs(1) - 1)
    def _():
        yk = acc_ref[...].astype(jnp.bfloat16)
        yout_ref[...] = yk
        zout_ref[...] = zin_ref[...] + jnp.dot(
            yk, w_ref[...], preferred_element_type=jnp.float32)


def _gcn_tiled(x_p, s_i8, w_in, b_in, w_taps, b_sums, w_out, b_out,
               *, n_layers, n_taps, n_p, ci_p, ch_p, co_p, tm, tk, vmem_limit):
    n_row = n_p // tm
    n_col = n_p // tk
    cp1 = pltpu.CompilerParams(dimension_semantics=("parallel",),
                               vmem_limit_bytes=vmem_limit)
    cp2 = pltpu.CompilerParams(dimension_semantics=("parallel", "arbitrary"),
                               vmem_limit_bytes=vmem_limit)

    def rows(cols):
        return pl.BlockSpec((tm, cols), lambda i: (i, 0))

    def full1(shape):
        return pl.BlockSpec(shape, lambda i: (0,) * len(shape))

    # readin MLP
    h = pl.pallas_call(
        functools.partial(_linear_kernel, True),
        grid=(n_row,),
        in_specs=[rows(ci_p), full1(w_in.shape), full1(b_in.shape)],
        out_specs=rows(ch_p),
        out_shape=jax.ShapeDtypeStruct((n_p, ch_p), jnp.float32),
        compiler_params=cp1,
    )(x_p, w_in, b_in)

    for l in range(n_layers):
        base = l * (n_taps + 1)
        y, z = pl.pallas_call(
            _zinit_kernel,
            grid=(n_row,),
            in_specs=[rows(ch_p), full1((ch_p, ch_p)), full1((1, ch_p))],
            out_specs=[rows(ch_p), rows(ch_p)],
            out_shape=(jax.ShapeDtypeStruct((n_p, ch_p), jnp.bfloat16),
                       jax.ShapeDtypeStruct((n_p, ch_p), jnp.float32)),
            compiler_params=cp1,
        )(h, w_taps[base], b_sums[l])

        for k in range(1, n_taps + 1):
            y, z = pl.pallas_call(
                _hop_kernel,
                grid=(n_row, n_col),
                in_specs=[pl.BlockSpec((tm, tk), lambda i, j: (i, j)),      # S
                          pl.BlockSpec((tk, ch_p), lambda i, j: (j, 0)),    # y
                          pl.BlockSpec((ch_p, ch_p), lambda i, j: (0, 0)),  # W_k
                          pl.BlockSpec((tm, ch_p), lambda i, j: (i, 0))],   # z_in
                out_specs=[pl.BlockSpec((tm, ch_p), lambda i, j: (i, 0)),
                           pl.BlockSpec((tm, ch_p), lambda i, j: (i, 0))],
                out_shape=(jax.ShapeDtypeStruct((n_p, ch_p), jnp.bfloat16),
                           jax.ShapeDtypeStruct((n_p, ch_p), jnp.float32)),
                scratch_shapes=[pltpu.VMEM((tm, ch_p), jnp.float32)],
                input_output_aliases={3: 1},        # z accumulated in place
                compiler_params=cp2,
            )(s_i8, y, w_taps[base + k], z)
        h = z  # residual already folded into z init

    # readout MLP
    return pl.pallas_call(
        functools.partial(_linear_kernel, False),
        grid=(n_row,),
        in_specs=[rows(ch_p), full1(w_out.shape), full1(b_out.shape)],
        out_specs=rows(co_p),
        out_shape=jax.ShapeDtypeStruct((n_p, co_p), jnp.float32),
        compiler_params=cp1,
    )(h, w_out, b_out)


# -------------------------------- wrapper ---------------------------------- #

def gcn_forward(x, S, params, *, n_layers, n_taps, force_path=None):
    N, c_in = x.shape
    c_hid = params["w_in"].shape[1]
    c_out = params["w_out"].shape[1]
    f32, bf16 = jnp.float32, jnp.bfloat16

    ci_p = _round_up(c_in, LANE)
    ch_p = _round_up(c_hid, LANE)
    co_p = _round_up(c_out, LANE)
    K1 = n_taps + 1
    vmem_limit = _vmem_limit_bytes()

    # padded / bf16 parameters (zero padding keeps the math exact)
    w_taps_p = [_pad2(params["w_taps"][i], ch_p, ch_p).astype(bf16)
                for i in range(n_layers * K1)]
    b_sums = [_pad2(jnp.sum(params["b_taps"][l * K1:(l + 1) * K1], axis=0,
                            keepdims=True), 1, ch_p).astype(f32)
              for l in range(n_layers)]
    w_in = _pad2(params["w_in"], ci_p, ch_p).astype(bf16)
    b_in = _pad2(params["b_in"].reshape(1, -1), 1, ch_p).astype(f32)
    w_out = _pad2(params["w_out"], ch_p, co_p).astype(bf16)
    b_out = _pad2(params["b_out"].reshape(1, -1), 1, co_p).astype(f32)

    # choose path: fully fused single kernel whenever the graph fits in VMEM
    n_f = _round_up(max(N, 1), LANE)
    fused_bytes = (4 * n_f * n_f                               # S (bf16, 2x)
                   + 8 * n_f * (ci_p + 3 * ch_p + co_p)        # x/h/y/z/out
                   + 4 * (ci_p * ch_p + n_layers * K1 * ch_p * ch_p
                          + ch_p * co_p))                      # weights
    use_fused = fused_bytes < 0.5 * vmem_limit
    if force_path == "fused":
        use_fused = True
    elif force_path == "tiled":
        use_fused = False

    if use_fused:
        n_p = n_f
        x_p = _pad2(x, n_p, ci_p).astype(bf16)
        s_p = _pad2(S, n_p, n_p).astype(bf16)           # 0/1 -> exact in bf16
        w_stack = jnp.stack([jnp.concatenate(w_taps_p[l * K1:(l + 1) * K1], 0)
                             for l in range(n_layers)])  # (L, K1*ch_p, ch_p)
        b_stack = jnp.stack(b_sums)                      # (L, 1, ch_p)
        out = _gcn_fused(x_p, s_p, w_in, b_in, w_stack, b_stack, w_out, b_out,
                         n_layers=n_layers, n_taps=n_taps, n_p=n_p,
                         ch_p=ch_p, co_p=co_p, vmem_limit=vmem_limit)
    else:
        tm, tk = 256, 512                                # VMEM use N-independent
        n_p = _round_up(N, tk)
        x_p = _pad2(x, n_p, ci_p).astype(bf16)
        s_i8 = _pad2(S, n_p, n_p).astype(jnp.int8)       # halve S HBM traffic
        out = _gcn_tiled(x_p, s_i8, w_in, b_in, w_taps_p, b_sums, w_out, b_out,
                         n_layers=n_layers, n_taps=n_taps, n_p=n_p, ci_p=ci_p,
                         ch_p=ch_p, co_p=co_p, tm=tm, tk=tk,
                         vmem_limit=vmem_limit)

    return out[:N, :c_out]


# ------------------------------- reference --------------------------------- #

def gcn_reference(x, S, p, *, n_layers, n_taps, cast=jnp.bfloat16):
    def mm(a, b):
        return jnp.dot(a.astype(cast), b.astype(cast),
                       preferred_element_type=jnp.float32)

    h = _leaky_relu(mm(x, p["w_in"]) + p["b_in"])
    for l in range(n_layers):
        base = l * (n_taps + 1)
        y = _leaky_relu(h)
        z = mm(y, p["w_taps"][base]) + p["b_taps"][base]
        for k in range(1, n_taps + 1):
            y = mm(S, y)
            z = z + mm(y, p["w_taps"][base + k]) + p["b_taps"][base + k]
        h = h + z
    return mm(h, p["w_out"]) + p["b_out"]


def make_params(key, in_channels, n_channels, out_channels, n_layers, n_taps):
    """Deterministic glorot-style initialization (synthetic; not a checkpoint)."""
    ks = jax.random.split(key, 4)
    n_tap_mats = n_layers * (n_taps + 1)

    def glorot(k, fan_in, fan_out, shape):
        scale = jnp.sqrt(2.0 / (fan_in + fan_out))
        return scale * jax.random.normal(k, shape, dtype=jnp.float32)

    return {
        "w_in": glorot(ks[0], in_channels, n_channels, (in_channels, n_channels)),
        "b_in": jnp.zeros((1, n_channels), jnp.float32),
        "w_taps": glorot(ks[1], n_channels, n_channels,
                         (n_tap_mats, n_channels, n_channels)),
        "b_taps": 0.01 * jax.random.normal(ks[2], (n_tap_mats, n_channels),
                                           dtype=jnp.float32),
        "w_out": glorot(ks[3], n_channels, out_channels, (n_channels, out_channels)),
        "b_out": jnp.zeros((1, out_channels), jnp.float32),
    }


if __name__ == "__main__":
    # Small shapes: 16 graph nodes, 4 input features, 32 hidden, 4 output.
    N = 16
    in_channels = 4
    n_channels = 32
    out_channels = 4
    n_taps = 2
    n_layers = 2

    key = jax.random.PRNGKey(0)
    k_x, k_p = jax.random.split(key)
    x = jax.random.normal(k_x, (N, in_channels), dtype=jnp.float32)

    # Ring graph edge_index -> dense shift operator S[dst, src] = 1.
    src = jnp.concatenate([jnp.arange(N), (jnp.arange(N) + 1) % N])
    dst = jnp.concatenate([(jnp.arange(N) + 1) % N, jnp.arange(N)])
    S = jnp.zeros((N, N), jnp.float32).at[dst, src].set(1.0)

    params = make_params(k_p, in_channels, n_channels, out_channels,
                         n_layers, n_taps)
    ref = gcn_reference(x, S, params, n_layers=n_layers, n_taps=n_taps)

    # Exercise both paths (fused is the default at these shapes; the tiled
    # large-graph path is force-checked for correctness at small shapes too).
    for path in ("fused", "tiled"):
        fwd = jax.jit(functools.partial(gcn_forward, n_layers=n_layers,
                                        n_taps=n_taps, force_path=path))
        out = jax.block_until_ready(fwd(x, S, params))
        assert out.shape == (N, out_channels)
        assert jnp.allclose(out, ref, atol=1e-3, rtol=1e-3), \
            f"{path} path mismatch vs JAX reference"

    # TODO(synk): dropout is identity here (p=0.0 / eval mode), so it is omitted.
    print("KERNEL_OK")
</pallas_src>

<mosaic_0001>
module attributes {stable_mosaic.version = 11 : i64} {
  func.func @_fused_gcn_kernel(%arg0: i32, %arg1: memref<128x128xbf16, #tpu.memory_space<vmem>>, %arg2: memref<128x128xbf16, #tpu.memory_space<vmem>>, %arg3: memref<128x128xbf16, #tpu.memory_space<vmem>>, %arg4: memref<1x128xf32, #tpu.memory_space<vmem>>, %arg5: memref<1x384x128xbf16, #tpu.memory_space<vmem>>, %arg6: memref<1x1x128xf32, #tpu.memory_space<vmem>>, %arg7: memref<128x128xbf16, #tpu.memory_space<vmem>>, %arg8: memref<1x128xf32, #tpu.memory_space<vmem>>, %arg9: memref<128x128xf32, #tpu.memory_space<vmem>>, %arg10: memref<128x128xf32, #tpu.memory_space<vmem>>) attributes {dimension_semantics = [#tpu.dimension_semantics<arbitrary>], iteration_bounds = array<i64: 2>, scalar_prefetch = 0 : i64, scratch_operands = 1 : i64, tpu.core_type = #tpu.core_type<tc>, window_params = [{pipeline_mode = #tpu.pipeline_mode<synchronous>, transform_indices = @transform_0, window_bounds = array<i64: 128, 128>}, {pipeline_mode = #tpu.pipeline_mode<synchronous>, transform_indices = @transform_1, window_bounds = array<i64: 128, 128>}, {pipeline_mode = #tpu.pipeline_mode<synchronous>, transform_indices = @transform_2, window_bounds = array<i64: 128, 128>}, {pipeline_mode = #tpu.pipeline_mode<synchronous>, transform_indices = @transform_3, window_bounds = array<i64: 1, 128>}, {transform_indices = @transform_4, window_bounds = array<i64: 1, 384, 128>}, {transform_indices = @transform_5, window_bounds = array<i64: 1, 1, 128>}, {pipeline_mode = #tpu.pipeline_mode<synchronous>, transform_indices = @transform_6, window_bounds = array<i64: 128, 128>}, {pipeline_mode = #tpu.pipeline_mode<synchronous>, transform_indices = @transform_7, window_bounds = array<i64: 1, 128>}, {pipeline_mode = #tpu.pipeline_mode<synchronous>, transform_indices = @transform_8, window_bounds = array<i64: 128, 128>}]} {
    %c0_i32 = arith.constant 0 : i32
    %0 = arith.cmpi eq, %arg0, %c0_i32 : i32
    %1 = arith.extui %0 : i1 to i32
    %c0_i32_0 = arith.constant 0 : i32
    %2 = arith.cmpi ne, %1, %c0_i32_0 : i32
    scf.if %2 {
      %c0_23 = arith.constant 0 : index
      %c0_24 = arith.constant 0 : index
      %35 = vector.load %arg1[%c0_23, %c0_24] : memref<128x128xbf16, #tpu.memory_space<vmem>>, vector<128x128xbf16>
      %c0_25 = arith.constant 0 : index
      %c0_26 = arith.constant 0 : index
      %36 = vector.load %arg3[%c0_25, %c0_26] : memref<128x128xbf16, #tpu.memory_space<vmem>>, vector<128x128xbf16>
      %cst_27 = arith.constant dense<0.000000e+00> : vector<128x128xf32>
      %37 = tpu.matmul %35, %36, %cst_27 {dimension_numbers = #tpu.dot_dimension_numbers<[1], [0], [0], [1], [0, 0, 1, 1], [], []>} : vector<128x128xbf16>, vector<128x128xbf16>, vector<128x128xf32> -> vector<128x128xf32>
      %c0_28 = arith.constant 0 : index
      %c0_29 = arith.constant 0 : index
      %38 = vector.load %arg4[%c0_28, %c0_29] : memref<1x128xf32, #tpu.memory_space<vmem>>, vector<1x128xf32>
      %39 = vector.broadcast %38 : vector<1x128xf32> to vector<128x128xf32>
      %40 = arith.addf %37, %39 : vector<128x128xf32>
      %cst_30 = arith.constant 0.000000e+00 : f32
      %41 = vector.broadcast %cst_30 : f32 to vector<128x128xf32>
      %42 = arith.cmpf oge, %40, %41 : vector<128x128xf32>
      %cst_31 = arith.constant 0.00999999977 : f32
      %43 = vector.broadcast %cst_31 : f32 to vector<128x128xf32>
      %44 = arith.mulf %43, %40 : vector<128x128xf32>
      %45 = arith.select %42, %40, %44 : vector<128x128xi1>, vector<128x128xf32>
      %c0_32 = arith.constant 0 : index
      %c0_33 = arith.constant 0 : index
      %46 = vector.load %arg10[%c0_32, %c0_33] : memref<128x128xf32, #tpu.memory_space<vmem>>, vector<128x128xf32>
      tpu.vector_store %arg10[%c0_32, %c0_33], %45 {strides = array<i32>} : memref<128x128xf32, #tpu.memory_space<vmem>>, vector<128x128xf32>,
    } else {
    }
    %c0 = arith.constant 0 : index
    %c0_1 = arith.constant 0 : index
    %3 = vector.load %arg10[%c0, %c0_1] : memref<128x128xf32, #tpu.memory_space<vmem>>, vector<128x128xf32>
    %c0_2 = arith.constant 0 : index
    %c0_3 = arith.constant 0 : index
    %4 = vector.load %arg2[%c0_2, %c0_3] : memref<128x128xbf16, #tpu.memory_space<vmem>>, vector<128x128xbf16>
    %cst = arith.constant 0.000000e+00 : f32
    %5 = vector.broadcast %cst : f32 to vector<128x128xf32>
    %6 = arith.cmpf oge, %3, %5 : vector<128x128xf32>
    %cst_4 = arith.constant 0.00999999977 : f32
    %7 = vector.broadcast %cst_4 : f32 to vector<128x128xf32>
    %8 = arith.mulf %7, %3 : vector<128x128xf32>
    %9 = arith.select %6, %3, %8 : vector<128x128xi1>, vector<128x128xf32>
    %10 = arith.truncf %9 : vector<128x128xf32> to vector<128x128xbf16>
    %c0_5 = arith.constant 0 : index
    %c0_6 = arith.constant 0 : index
    %c0_7 = arith.constant 0 : index
    %11 = vector.load %arg5[%c0_5, %c0_6, %c0_7] : memref<1x384x128xbf16, #tpu.memory_space<vmem>>, vector<1x128x128xbf16>
    %12 = vector.shape_cast %11 : vector<1x128x128xbf16> to vector<128x128xbf16>
    %cst_8 = arith.constant dense<0.000000e+00> : vector<128x128xf32>
    %13 = tpu.matmul %10, %12, %cst_8 {dimension_numbers = #tpu.dot_dimension_numbers<[1], [0], [0], [1], [0, 0, 1, 1], [], []>} : vector<128x128xbf16>, vector<128x128xbf16>, vector<128x128xf32> -> vector<128x128xf32>
    %c0_9 = arith.constant 0 : index
    %c0_10 = arith.constant 0 : index
    %c0_11 = arith.constant 0 : index
    %14 = vector.load %arg6[%c0_9, %c0_10, %c0_11] : memref<1x1x128xf32, #tpu.memory_space<vmem>>, vector<1x1x128xf32>
    %15 = vector.shape_cast %14 : vector<1x1x128xf32> to vector<1x128xf32>
    %16 = vector.broadcast %15 : vector<1x128xf32> to vector<128x128xf32>
    %17 = arith.addf %13, %16 : vector<128x128xf32>
    %cst_12 = arith.constant dense<0.000000e+00> : vector<128x128xf32>
    %18 = tpu.matmul %4, %10, %cst_12 {dimension_numbers = #tpu.dot_dimension_numbers<[1], [0], [0], [1], [0, 0, 1, 1], [], []>} : vector<128x128xbf16>, vector<128x128xbf16>, vector<128x128xf32> -> vector<128x128xf32>
    %19 = arith.truncf %18 : vector<128x128xf32> to vector<128x128xbf16>
    %c0_13 = arith.constant 0 : index
    %c128 = arith.constant 128 : index
    %c0_14 = arith.constant 0 : index
    %20 = vector.load %arg5[%c0_13, %c128, %c0_14] : memref<1x384x128xbf16, #tpu.memory_space<vmem>>, vector<1x128x128xbf16>
    %21 = vector.shape_cast %20 : vector<1x128x128xbf16> to vector<128x128xbf16>
    %cst_15 = arith.constant dense<0.000000e+00> : vector<128x128xf32>
    %22 = tpu.matmul %19, %21, %cst_15 {dimension_numbers = #tpu.dot_dimension_numbers<[1], [0], [0], [1], [0, 0, 1, 1], [], []>} : vector<128x128xbf16>, vector<128x128xbf16>, vector<128x128xf32> -> vector<128x128xf32>
    %23 = arith.addf %17, %22 : vector<128x128xf32>
    %cst_16 = arith.constant dense<0.000000e+00> : vector<128x128xf32>
    %24 = tpu.matmul %4, %19, %cst_16 {dimension_numbers = #tpu.dot_dimension_numbers<[1], [0], [0], [1], [0, 0, 1, 1], [], []>} : vector<128x128xbf16>, vector<128x128xbf16>, vector<128x128xf32> -> vector<128x128xf32>
    %25 = arith.truncf %24 : vector<128x128xf32> to vector<128x128xbf16>
    %c0_17 = arith.constant 0 : index
    %c256 = arith.constant 256 : index
    %c0_18 = arith.constant 0 : index
    %26 = vector.load %arg5[%c0_17, %c256, %c0_18] : memref<1x384x128xbf16, #tpu.memory_space<vmem>>, vector<1x128x128xbf16>
    %27 = vector.shape_cast %26 : vector<1x128x128xbf16> to vector<128x128xbf16>
    %cst_19 = arith.constant dense<0.000000e+00> : vector<128x128xf32>
    %28 = tpu.matmul %25, %27, %cst_19 {dimension_numbers = #tpu.dot_dimension_numbers<[1], [0], [0], [1], [0, 0, 1, 1], [], []>} : vector<128x128xbf16>, vector<128x128xbf16>, vector<128x128xf32> -> vector<128x128xf32>
    %29 = arith.addf %23, %28 : vector<128x128xf32>
    %30 = arith.addf %3, %29 : vector<128x128xf32>
    %c0_20 = arith.constant 0 : index
    %c0_21 = arith.constant 0 : index
    %31 = vector.load %arg10[%c0_20, %c0_21] : memref<128x128xf32, #tpu.memory_space<vmem>>, vector<128x128xf32>
    tpu.vector_store %arg10[%c0_20, %c0_21], %30 {strides = array<i32>} : memref<128x128xf32, #tpu.memory_space<vmem>>, vector<128x128xf32>,
    %c1_i32 = arith.constant 1 : i32
    %32 = arith.cmpi eq, %arg0, %c1_i32 : i32
    %33 = arith.extui %32 : i1 to i32
    %c0_i32_22 = arith.constant 0 : i32
    %34 = arith.cmpi ne, %33, %c0_i32_22 : i32
    scf.if %34 {
      %c0_23 = arith.constant 0 : index
      %c0_24 = arith.constant 0 : index
      %35 = vector.load %arg10[%c0_23, %c0_24] : memref<128x128xf32, #tpu.memory_space<vmem>>, vector<128x128xf32>
      %36 = arith.truncf %35 : vector<128x128xf32> to vector<128x128xbf16>
      %c0_25 = arith.constant 0 : index
      %c0_26 = arith.constant 0 : index
      %37 = vector.load %arg7[%c0_25, %c0_26] : memref<128x128xbf16, #tpu.memory_space<vmem>>, vector<128x128xbf16>
      %cst_27 = arith.constant dense<0.000000e+00> : vector<128x128xf32>
      %38 = tpu.matmul %36, %37, %cst_27 {dimension_numbers = #tpu.dot_dimension_numbers<[1], [0], [0], [1], [0, 0, 1, 1], [], []>} : vector<128x128xbf16>, vector<128x128xbf16>, vector<128x128xf32> -> vector<128x128xf32>
      %c0_28 = arith.constant 0 : index
      %c0_29 = arith.constant 0 : index
      %39 = vector.load %arg8[%c0_28, %c0_29] : memref<1x128xf32, #tpu.memory_space<vmem>>, vector<1x128xf32>
      %40 = vector.broadcast %39 : vector<1x128xf32> to vector<128x128xf32>
      %41 = arith.addf %38, %40 : vector<128x128xf32>
      %c0_30 = arith.constant 0 : index
      %c0_31 = arith.constant 0 : index
      %42 = vector.load %arg9[%c0_30, %c0_31] : memref<128x128xf32, #tpu.memory_space<vmem>>, vector<128x128xf32>
      tpu.vector_store %arg9[%c0_30, %c0_31], %41 {strides = array<i32>} : memref<128x128xf32, #tpu.memory_space<vmem>>, vector<128x128xf32>,
    } else {
    }
    return
  }
  func.func @transform_0(%arg0: i32) -> (i32, i32) {
    %c0_i32 = arith.constant 0 : i32
    %c0_i32_0 = arith.constant 0 : i32
    %c0_i32_1 = arith.constant 0 : i32
    return %c0_i32, %c0_i32_0 : i32, i32
  }
  func.func @transform_1(%arg0: i32) -> (i32, i32) {
    %c0_i32 = arith.constant 0 : i32
    %c0_i32_0 = arith.constant 0 : i32
    %c0_i32_1 = arith.constant 0 : i32
    return %c0_i32, %c0_i32_0 : i32, i32
  }
  func.func @transform_2(%arg0: i32) -> (i32, i32) {
    %c0_i32 = arith.constant 0 : i32
    %c0_i32_0 = arith.constant 0 : i32
    %c0_i32_1 = arith.constant 0 : i32
    return %c0_i32, %c0_i32_0 : i32, i32
  }
  func.func @transform_3(%arg0: i32) -> (i32, i32) {
    %c0_i32 = arith.constant 0 : i32
    %c0_i32_0 = arith.constant 0 : i32
    %c0_i32_1 = arith.constant 0 : i32
    return %c0_i32, %c0_i32_0 : i32, i32
  }
  func.func @transform_4(%arg0: i32) -> (i32, i32, i32) {
    %c0_i32 = arith.constant 0 : i32
    %c0_i32_0 = arith.constant 0 : i32
    %c0_i32_1 = arith.constant 0 : i32
    return %arg0, %c0_i32, %c0_i32_0 : i32, i32, i32
  }
  func.func @transform_5(%arg0: i32) -> (i32, i32, i32) {
    %c0_i32 = arith.constant 0 : i32
    %c0_i32_0 = arith.constant 0 : i32
    %c0_i32_1 = arith.constant 0 : i32
    return %arg0, %c0_i32, %c0_i32_0 : i32, i32, i32
  }
  func.func @transform_6(%arg0: i32) -> (i32, i32) {
    %c0_i32 = arith.constant 0 : i32
    %c0_i32_0 = arith.constant 0 : i32
    %c0_i32_1 = arith.constant 0 : i32
    return %c0_i32, %c0_i32_0 : i32, i32
  }
  func.func @transform_7(%arg0: i32) -> (i32, i32) {
    %c0_i32 = arith.constant 0 : i32
    %c0_i32_0 = arith.constant 0 : i32
    %c0_i32_1 = arith.constant 0 : i32
    return %c0_i32, %c0_i32_0 : i32, i32
  }
  func.func @transform_8(%arg0: i32) -> (i32, i32) {
    %c0_i32 = arith.constant 0 : i32
    %c0_i32_0 = arith.constant 0 : i32
    %c0_i32_1 = arith.constant 0 : i32
    return %c0_i32, %c0_i32_0 : i32, i32
  }
}

</mosaic_0001>

<bundles_post_ra>
// kernel: gcn_forward.1
= control target key start
LH: loop header
LB: loop body
LE: loop exit
PB: predicated region body
PF: predicated region fallthrough
CT: control target
= control target key end

     0   :  { %s2373_s27 = smov 0   ;;  %s2786_s0 = inlined_call_operand.vmem [shape: bf16[128,128], index: 0, kind: input, shape index: {}]   ;;  %s2787_s1 = inlined_call_operand.vmem [shape: bf16[128,128], index: 1, kind: input, shape index: {}]   ;;  %s2788_s2 = inlined_call_operand.vmem [shape: bf16[128,128], index: 2, kind: input, shape index: {}]   ;;  %s2789_s3 = inlined_call_operand.vmem [shape: f32[1,128], index: 3, kind: input, shape index: {}]   ;;  %s2790_s4 = inlined_call_operand.vmem [shape: bf16[2,384,128], index: 4, kind: input, shape index: {}]   ;;  %s2791_s5 = inlined_call_operand.vmem [shape: f32[2,1,128], index: 5, kind: input, shape index: {}]   ;;  %s2792_s6 = inlined_call_operand.vmem [shape: bf16[128,128], index: 6, kind: input, shape index: {}]   ;;  %s2793_s7 = inlined_call_operand.vmem [shape: f32[1,128], index: 7, kind: input, shape index: {}]   ;;  %s2794_s8 = inlined_call_operand.vmem [shape: f32[128,128], index: 8, kind: output, shape index: {}]  }
   0x1 LB: > { %s2379_s28 = sadd.s32 4294967295, %s2326_s27   ;;  %p1758_p0 = scmp.ge.s32.totalorder %s2326_s27, 1  ;;  %s2326_s27 = sphi %s2373_s27, %s18_s27  }
   0x2   : > { %p265_p1 = scmp.lt.s32.totalorder %s2326_s27, 3 }
   0x4   : > { %p266_p2 = pnand %p1758_p0, %p265_p1 }
   0x5   : > { %p297_p3 = scmp.lt.s32.totalorder (!%p266_p2), %s2379_s28, 1  ;;  %p1760_p4 = scmp.ne.s32.totalorder (!%p266_p2), %s2379_s28, 0 }
   0x6   : > { %269 = sbr.rel (%p266_p2) target bundleno = 1281 (0x501), region = 52 }
   0xd   : > { %s2385_s29 = scalar_select %p297_p3, %s2379_s28, 1 }
   0xe   : > { %309 = sbr.rel (%p1760_p4) target bundleno = 279 (0x117), region = 56  ;;  %v2264_v0 = vld [vmem:[%s2788_s2] sm:$0xff] (!%p1760_p4)   ;;  %v2265_v1 = vld [vmem:[%s2788_s2 + $0x8] sm:$0xff] (!%p1760_p4)   ;;  %v2266_v2 = vld [vmem:[%s2788_s2 + $0x10] sm:$0xff] (!%p1760_p4)  }
   0xf   : > { %s2255_s30 = smul.u32 192, %s2385_s29  ;;  %s304_s11 = scalar_lea.vmem %s2791_s5, %s2385_s29  ;;  %1935 = vmatprep.subr.bf16.mxu0 (!%p1760_p4), %v2264_v0  ;;  %2159 = vmatprep.subr.bf16.mxu1 (!%p1760_p4), %v2264_v0  ;;  %v2267_v3 = vld [vmem:[%s2788_s2 + $0x18] sm:$0xff] (!%p1760_p4)   ;;  %v2272_v4 = vld [vmem:[%s2786_s0] sm:$0xff] (!%p1760_p4)   ;;  %v2269_v7 = vld [vmem:[%s2788_s2 + $0x28] sm:$0xff] (!%p1760_p4)  }
  0x10   : > { %1936 = vmatpush3.bf16.msra.mxu0 (!%p1760_p4), %v2264_v0  ;;  %2167 = vmatpush3.bf16.msra.mxu1 (!%p1760_p4), %v2264_v0  ;;  %v2273_v5 = vld [vmem:[%s2786_s0 + $0x20] sm:$0xff] (!%p1760_p4)   ;;  %v2270_v8 = vld [vmem:[%s2788_s2 + $0x30] sm:$0xff] (!%p1760_p4)   ;;  %v2271_v9 = vld [vmem:[%s2788_s2 + $0x38] sm:$0xff] (!%p1760_p4)  }
  0x11   : > { %s2395_s14 = scalar_lea.vmem %s2790_s4, %s2255_s30  ;;  %1937 = vmatprep.subr.bf16.mxu0 (!%p1760_p4), %v2265_v1  ;;  %2160 = vmatprep.subr.bf16.mxu1 (!%p1760_p4), %v2265_v1  ;;  %v2268_v6 = vld [vmem:[%s2788_s2 + $0x20] sm:$0xff] (!%p1760_p4)   ;;  %v2274_v10 = vld [vmem:[%s2786_s0 + $0x8] sm:$0xff] (!%p1760_p4)   ;;  %v2276_v12 = vld [vmem:[%s2786_s0 + $0x10] sm:$0xff] (!%p1760_p4)  }
  0x12   : > { %1951 = vmatprep.mubr.bf16.mxu0 (!%p1760_p4), %v2272_v4  ;;  %1959 = vmatprep.mubr.bf16.mxu1 (!%p1760_p4), %v2273_v5  ;;  %v2275_v11 = vld [vmem:[%s2786_s0 + $0x28] sm:$0xff] (!%p1760_p4)   ;;  %v2277_v13 = vld [vmem:[%s2786_s0 + $0x30] sm:$0xff] (!%p1760_p4)   ;;  %v2278_v14 = vld [vmem:[%s2786_s0 + $0x18] sm:$0xff] (!%p1760_p4)  }
  0x13   : > { %v2279_v15 = vld [vmem:[%s2786_s0 + $0x38] sm:$0xff] (!%p1760_p4)   ;;  %v2449_v16 = vld [vmem:[%s2789_s3] ss:$0 sm:$0xff] (!%p1760_p4) }
  0x14   : > { %1938 = vmatpush3.bf16.msra.mxu0 (!%p1760_p4), %v2265_v1  ;;  %2168 = vmatpush3.bf16.msra.mxu1 (!%p1760_p4), %v2265_v1 }
  0x15   : > { %1939 = vmatprep.subr.bf16.mxu0 %v2266_v2  ;;  %2161 = vmatprep.subr.bf16.mxu1 %v2266_v2 }
  0x18   : > { %1940 = vmatpush3.bf16.msra.mxu0 %v2266_v2  ;;  %2169 = vmatpush3.bf16.msra.mxu1 %v2266_v2 }
  0x19   : > { %1941 = vmatprep.subr.bf16.mxu0 %v2267_v3  ;;  %2162 = vmatprep.subr.bf16.mxu1 %v2267_v3 }
  0x1c   : > { %1942 = vmatpush3.bf16.msra.mxu0 %v2267_v3  ;;  %2170 = vmatpush3.bf16.msra.mxu1 %v2267_v3 }
  0x1d   : > { %1943 = vmatprep.subr.bf16.mxu0 %v2268_v6  ;;  %2163 = vmatprep.subr.bf16.mxu1 %v2268_v6 }
  0x20   : > { %1944 = vmatpush3.bf16.msra.mxu0 %v2268_v6  ;;  %2171 = vmatpush3.bf16.msra.mxu1 %v2268_v6 }
  0x21   : > { %1945 = vmatprep.subr.bf16.mxu0 %v2269_v7  ;;  %2164 = vmatprep.subr.bf16.mxu1 %v2269_v7 }
  0x24   : > { %1946 = vmatpush3.bf16.msra.mxu0 %v2269_v7  ;;  %2172 = vmatpush3.bf16.msra.mxu1 %v2269_v7 }
  0x25   : > { %1947 = vmatprep.subr.bf16.mxu0 %v2270_v8  ;;  %2165 = vmatprep.subr.bf16.mxu1 %v2270_v8 }
  0x28   : > { %1948 = vmatpush3.bf16.msra.mxu0 %v2270_v8  ;;  %2173 = vmatpush3.bf16.msra.mxu1 %v2270_v8 }
  0x29   : > { %1949 = vmatprep.subr.bf16.mxu0 %v2271_v9  ;;  %2166 = vmatprep.subr.bf16.mxu1 %v2271_v9 }
  0x2c   : > { %1950 = vmatpush3.bf16.msra.mxu0 %v2271_v9  ;;  %2174 = vmatpush3.bf16.msra.mxu1 %v2271_v9 }
  0x2f   : > { %1952 = vmatmul.mubr.bf16.vlgmr.msra.gmra.mrb[0].mxu0 %v2274_v10  ;;  %1960 = vmatmul.mubr.bf16.vlgmr.msra.gmra.mrb[0].mxu1 %v2275_v11 }
  0x30   : > { %1955 = vmatprep.mubr.bf16.mxu0 %v2276_v12  ;;  %1963 = vmatprep.mubr.bf16.mxu1 %v2277_v13 }
  0x37   : > { %1956 = vmatmul.mubr.bf16.gmra.mrb[4].mxu0 %v2278_v14  ;;  %1964 = vmatmul.mubr.bf16.gmra.mrb[4].mxu1 %v2279_v15 }
 0x102   : > { %v1953_v17 = vpop.f32.mrb[0].mxu0  ;;  %v1961_v18 = vpop.f32.mrb[0].mxu1 }
 0x103   : > { %v488_v19 = vadd.f32 %v1953_v17, %v2449_v16  ;;  %v520_v20 = vadd.f32 %v1961_v18, %v2449_v16  ;;  %v479_v21 = vpop.f32.mrb[1].mxu0  ;;  %v511_v22 = vpop.f32.mrb[1].mxu1 }
 0x104   : > { %v480_v23 = vadd.f32 %v2449_v16, %v479_v21  ;;  %v512_v24 = vadd.f32 %v2449_v16, %v511_v22  ;;  %v1954_v25 = vpop.f32.mrb[2].mxu0  ;;  %v1962_v26 = vpop.f32.mrb[2].mxu1 }
 0x105   : > { %vm544_vm0 = vcmp.ge.f32.partialorder %v488_v19, 0.0  ;;  %v560_v27 = vmul.f32 0.01, %v488_v19  ;;  %vm552_vm1 = vcmp.ge.f32.partialorder %v520_v20, 0.0  ;;  %v568_v28 = vmul.f32 0.01, %v520_v20 }
 0x106   : > { %vm542_vm2 = vcmp.ge.f32.partialorder %v480_v23, 0.0  ;;  %v558_v29 = vmul.f32 0.01, %v480_v23  ;;  %vm550_vm3 = vcmp.ge.f32.partialorder %v512_v24, 0.0  ;;  %v566_v30 = vmul.f32 0.01, %v512_v24 }
 0x107   : > { %v576_v31 = vsel %vm544_vm0, %v488_v19, %v560_v27  ;;  %v584_v32 = vsel %vm552_vm1, %v520_v20, %v568_v28  ;;  %v491_v33 = vadd.f32 %v1954_v25, %v2449_v16  ;;  %v523_v34 = vadd.f32 %v1962_v26, %v2449_v16  ;;  %v482_v35 = vpop.f32.mrb[3].mxu0  ;;  %v514_v36 = vpop.f32.mrb[3].mxu1 }
 0x108   : > { %592 = vst [vmem:[#allocation2 + $0x10] sm:$0xff] %v576_v31  ;;  %600 = vst [vmem:[#allocation2 + $0x50] sm:$0xff] %v584_v32  ;;  %v574_v37 = vsel %vm542_vm2, %v480_v23, %v558_v29  ;;  %v582_v38 = vsel %vm550_vm3, %v512_v24, %v566_v30  ;;  %v483_v39 = vadd.f32 %v2449_v16, %v482_v35 }
 0x109   : > { %v515_v40 = vadd.f32 %v2449_v16, %v514_v36  ;;  %590 = vst [vmem:[#allocation2] sm:$0xff] %v574_v37  ;;  %598 = vst [vmem:[#allocation2 + $0x40] sm:$0xff] %v582_v38  ;;  %vm545_vm4 = vcmp.ge.f32.partialorder %v491_v33, 0.0  ;;  %v561_v41 = vmul.f32 0.01, %v491_v33  ;;  %vm553_vm5 = vcmp.ge.f32.partialorder %v523_v34, 0.0 }
 0x10a   : > { %v569_v42 = vmul.f32 0.01, %v523_v34  ;;  %vm543_vm6 = vcmp.ge.f32.partialorder %v483_v39, 0.0  ;;  %v559_v43 = vmul.f32 0.01, %v483_v39  ;;  %v1957_v47 = vpop.f32.mrb[4].mxu0 }
 0x10b   : > { %vm551_vm7 = vcmp.ge.f32.partialorder %v515_v40, 0.0  ;;  %v567_v44 = vmul.f32 0.01, %v515_v40  ;;  %v577_v45 = vsel %vm545_vm4, %v491_v33, %v561_v41  ;;  %v1965_v48 = vpop.f32.mrb[4].mxu1  ;;  %v504_v51 = vadd.f32 %v1957_v47, %v2449_v16  ;;  %v495_v53 = vpop.f32.mrb[5].mxu0 }
 0x10c   : > { %v585_v46 = vsel %vm553_vm5, %v523_v34, %v569_v42  ;;  %593 = vst [vmem:[#allocation2 + $0x18] sm:$0xff] %v577_v45  ;;  %v575_v49 = vsel %vm543_vm6, %v483_v39, %v559_v43  ;;  %v536_v52 = vadd.f32 %v1965_v48, %v2449_v16  ;;  %v527_v54 = vpop.f32.mrb[5].mxu1  ;;  %v496_v55 = vadd.f32 %v2449_v16, %v495_v53  ;;  %v1958_v57 = vpop.f32.mrb[6].mxu0 }
 0x10d   : > { %601 = vst [vmem:[#allocation2 + $0x58] sm:$0xff] %v585_v46  ;;  %v583_v50 = vsel %vm551_vm7, %v515_v40, %v567_v44  ;;  %591 = vst [vmem:[#allocation2 + $0x8] sm:$0xff] %v575_v49  ;;  %v528_v56 = vadd.f32 %v2449_v16, %v527_v54  ;;  %v1966_v58 = vpop.f32.mrb[6].mxu1  ;;  %vm548_vm8 = vcmp.ge.f32.partialorder %v504_v51, 0.0  ;;  %v564_v59 = vmul.f32 0.01, %v504_v51 }
 0x10e   : > { %599 = vst [vmem:[#allocation2 + $0x48] sm:$0xff] %v583_v50  ;;  %vm556_vm9 = vcmp.ge.f32.partialorder %v536_v52, 0.0  ;;  %v572_v60 = vmul.f32 0.01, %v536_v52  ;;  %vm546_vm10 = vcmp.ge.f32.partialorder %v496_v55, 0.0  ;;  %v507_v1 = vadd.f32 %v1958_v57, %v2449_v16  ;;  %v498_v3 = vpop.f32.mrb[7].mxu0 }
 0x10f   : > { %v562_v61 = vmul.f32 0.01, %v496_v55  ;;  %vm554_vm11 = vcmp.ge.f32.partialorder %v528_v56, 0.0  ;;  %v570_v62 = vmul.f32 0.01, %v528_v56  ;;  %v580_v63 = vsel %vm548_vm8, %v504_v51, %v564_v59  ;;  %v530_v4 = vpop.f32.mrb[7].mxu1 }
 0x110   : > { %v588_v0 = vsel %vm556_vm9, %v536_v52, %v572_v60  ;;  %v539_v2 = vadd.f32 %v1966_v58, %v2449_v16  ;;  %596 = vst [vmem:[#allocation2 + $0x30] sm:$0xff] %v580_v63  ;;  %v499_v7 = vadd.f32 %v2449_v16, %v498_v3  ;;  %v531_v8 = vadd.f32 %v2449_v16, %v530_v4 }
 0x111   : > { %604 = vst [vmem:[#allocation2 + $0x70] sm:$0xff] %v588_v0  ;;  %v578_v5 = vsel %vm546_vm10, %v496_v55, %v562_v61  ;;  %v586_v6 = vsel %vm554_vm11, %v528_v56, %v570_v62  ;;  %vm549_vm12 = vcmp.ge.f32.partialorder %v507_v1, 0.0  ;;  %v565_v9 = vmul.f32 0.01, %v507_v1 }
 0x112   : > { %594 = vst [vmem:[#allocation2 + $0x20] sm:$0xff] %v578_v5  ;;  %602 = vst [vmem:[#allocation2 + $0x60] sm:$0xff] %v586_v6  ;;  %vm557_vm13 = vcmp.ge.f32.partialorder %v539_v2, 0.0  ;;  %v573_v10 = vmul.f32 0.01, %v539_v2  ;;  %vm547_vm14 = vcmp.ge.f32.partialorder %v499_v7, 0.0 }
 0x113   : > { %v563_v11 = vmul.f32 0.01, %v499_v7  ;;  %vm555_vm15 = vcmp.ge.f32.partialorder %v531_v8, 0.0  ;;  %v571_v12 = vmul.f32 0.01, %v531_v8  ;;  %v581_v13 = vsel %vm549_vm12, %v507_v1, %v565_v9 }
 0x114   : > { %v589_v14 = vsel %vm557_vm13, %v539_v2, %v573_v10  ;;  %597 = vst [vmem:[#allocation2 + $0x38] sm:$0xff] %v581_v13 }
 0x115   : > { %605 = vst [vmem:[#allocation2 + $0x78] sm:$0xff] %v589_v14  ;;  %v579_v15 = vsel %vm547_vm14, %v499_v7, %v563_v11  ;;  %v587_v17 = vsel %vm555_vm15, %v531_v8, %v571_v12 }
 0x116   : > { %595 = vst [vmem:[#allocation2 + $0x28] sm:$0xff] %v579_v15  ;;  %603 = vst [vmem:[#allocation2 + $0x68] sm:$0xff] %v587_v17 }
 0x117 PF: > { %v2467_v16 = vld [vmem:[#allocation2] sm:$0xff]  ;;  %v2469_v18 = vld [vmem:[#allocation2 + $0x8] sm:$0xff]  ;;  %v2471_v19 = vld [vmem:[#allocation2 + $0x10] sm:$0xff]  ;;  %p1811_p5 = scmp.ne.s32.totalorder %s2379_s28, 1 }
 0x118   : > { %vm638_vm0 = vcmp.ge.f32.partialorder %v2467_v16, 0.0  ;;  %vm639_vm1 = vcmp.ge.f32.partialorder %v2469_v18, 0.0  ;;  %v654_v20 = vmul.f32 0.01, %v2467_v16  ;;  %v655_v21 = vmul.f32 0.01, %v2469_v18 }
 0x119   : > { %v2477_v22 = vld [vmem:[#allocation2 + $0x18] sm:$0xff]  ;;  %vm640_vm2 = vcmp.ge.f32.partialorder %v2471_v19, 0.0  ;;  %v656_v23 = vmul.f32 0.01, %v2471_v19  ;;  %v2481_v24 = vld [vmem:[#allocation2 + $0x20] sm:$0xff]  ;;  %v2489_v29 = vld [vmem:[#allocation2 + $0x30] sm:$0xff] }
 0x11a   : > { %v670_v26 = vsel %vm638_vm0, %v2467_v16, %v654_v20  ;;  %v671_v27 = vsel %vm639_vm1, %v2469_v18, %v655_v21  ;;  %vm641_vm3 = vcmp.ge.f32.partialorder %v2477_v22, 0.0  ;;  %v657_v28 = vmul.f32 0.01, %v2477_v22  ;;  %v2500_v36 = vld [vmem:[#allocation2 + $0x40] sm:$0xff]  ;;  %v2507_v40 = vld [vmem:[#allocation2 + $0x48] sm:$0xff]  ;;  %v2511_v43 = vld [vmem:[#allocation2 + $0x50] sm:$0xff] }
 0x11b   : > { %v2491_v30 = vld [vmem:[#allocation2 + $0x38] sm:$0xff]  ;;  %v686_v31 = vpack.c.bf16 %v671_v27, %v670_v26  ;;  %v672_v32 = vsel %vm640_vm2, %v2471_v19, %v656_v23  ;;  %vm642_vm4 = vcmp.ge.f32.partialorder %v2481_v24, 0.0  ;;  %v658_v34 = vmul.f32 0.01, %v2481_v24  ;;  %v2521_v46 = vld [vmem:[%s2787_s1] sm:$0xff]   ;;  %v2546_v58 = vld [vmem:[#allocation2 + $0x70] sm:$0xff] }
 0x11c   : > { %v673_v33 = vsel %vm641_vm3, %v2477_v22, %v657_v28  ;;  %vm644_vm6 = vcmp.ge.f32.partialorder %v2489_v29, 0.0  ;;  %vm645_vm7 = vcmp.ge.f32.partialorder %v2491_v30, 0.0  ;;  %v660_v38 = vmul.f32 0.01, %v2489_v29  ;;  %v2516_v45 = vld [vmem:[#allocation2 + $0x58] sm:$0xff]  ;;  %2015 = vmatprep.mubr.bf16.mxu1 %v2521_v46  ;;  %v2535_v51 = vld [vmem:[#allocation2 + $0x60] sm:$0xff] }
 0x11d   : > { %v2483_v25 = vld [vmem:[#allocation2 + $0x28] sm:$0xff]  ;;  %1999 = vmatprep.subr.bf16.mxu1 %v686_v31  ;;  %v2502_v37 = vpack.c.bf16 %v673_v33, %v672_v32  ;;  %v661_v39 = vmul.f32 0.01, %v2491_v30  ;;  %1983 = vmatprep.mubr.bf16.mxu0 %v686_v31  ;;  %v674_v41 = vsel %vm642_vm4, %v2481_v24, %v658_v34  ;;  %v662_v49 = vmul.f32 0.01, %v2500_v36  ;;  %v2555_v61 = vld [vmem:[#allocation2 + $0x78] sm:$0xff] }
 0x11e   : > { %vm643_vm5 = vcmp.ge.f32.partialorder %v2483_v25, 0.0  ;;  %v659_v35 = vmul.f32 0.01, %v2483_v25  ;;  %2000 = vmatpush3.bf16.msra.mxu1 %v686_v31  ;;  %v676_v47 = vsel %vm644_vm6, %v2489_v29, %v660_v38  ;;  %v663_v50 = vmul.f32 0.01, %v2507_v40  ;;  %v2537_v52 = vld [vmem:[#allocation2 + $0x68] sm:$0xff] }
 0x11f   : > { %2001 = vmatprep.subr.bf16.mxu1 %v2502_v37  ;;  %v677_v48 = vsel %vm645_vm7, %v2491_v30, %v661_v39  ;;  %vm646_vm8 = vcmp.ge.f32.partialorder %v2500_v36, 0.0  ;;  %vm647_vm9 = vcmp.ge.f32.partialorder %v2507_v40, 0.0  ;;  %vm648_vm10 = vcmp.ge.f32.partialorder %v2511_v43, 0.0  ;;  %v2288_v2 = vld [vmem:[%s2395_s14] sm:$0xff]   ;;  %v2289_v4 = vld [vmem:[%s2395_s14 + $0x8] sm:$0xff]   ;;  %v2290_v8 = vld [vmem:[%s2395_s14 + $0x10] sm:$0xff]  }
 0x120   : > { %v675_v42 = vsel %vm643_vm5, %v2483_v25, %v659_v35  ;;  %vm649_vm11 = vcmp.ge.f32.partialorder %v2516_v45, 0.0  ;;  %v2540_v53 = vpack.c.bf16 %v677_v48, %v676_v47  ;;  %v664_v54 = vmul.f32 0.01, %v2511_v43  ;;  %1967 = vmatprep.subr.bf16.mxu0 %v2288_v2  ;;  %v2291_v12 = vld [vmem:[%s2395_s14 + $0x18] sm:$0xff]   ;;  %v2292_v14 = vld [vmem:[%s2395_s14 + $0x20] sm:$0xff]   ;;  %v2591_v15 = vld [vmem:[%s2787_s1 + $0x8] sm:$0xff]  }
 0x121   : > { %v2514_v44 = vpack.c.bf16 %v675_v42, %v674_v41  ;;  %v678_v55 = vsel %vm646_vm8, %v2500_v36, %v662_v49  ;;  %v679_v56 = vsel %vm647_vm9, %v2507_v40, %v663_v50  ;;  %v665_v57 = vmul.f32 0.01, %v2516_v45  ;;  %1968 = vmatpush3.bf16.msra.mxu0 %v2288_v2  ;;  %v2596_v17 = vld [vmem:[%s2787_s1 + $0x10] sm:$0xff]   ;;  %v2293_v20 = vld [vmem:[%s2395_s14 + $0x28] sm:$0xff]   ;;  %v2605_v23 = vld [vmem:[%s2787_s1 + $0x18] sm:$0xff]  }
 0x122   : > { %2002 = vmatpush3.bf16.msra.mxu1 %v2502_v37  ;;  %vm650_vm12 = vcmp.ge.f32.partialorder %v2535_v51, 0.0  ;;  %vm651_vm13 = vcmp.ge.f32.partialorder %v2537_v52, 0.0  ;;  %v666_v59 = vmul.f32 0.01, %v2535_v51  ;;  %v2553_v60 = vpack.c.bf16 %v679_v56, %v678_v55  ;;  %1969 = vmatprep.subr.bf16.mxu0 %v2289_v4  ;;  %v2294_v21 = vld [vmem:[%s2395_s14 + $0x30] sm:$0xff]   ;;  %v2610_v26 = vld [vmem:[%s2787_s1 + $0x20] sm:$0xff]  }
 0x123   : > { %2003 = vmatprep.subr.bf16.mxu1 %v2514_v44  ;;  %v680_v62 = vsel %vm648_vm10, %v2511_v43, %v664_v54  ;;  %v681_v63 = vsel %vm649_vm11, %v2516_v45, %v665_v57  ;;  %v667_v0 = vmul.f32 0.01, %v2537_v52  ;;  %v668_v1 = vmul.f32 0.01, %v2546_v58  ;;  %v2295_v27 = vld [vmem:[%s2395_s14 + $0x38] sm:$0xff]   ;;  %v2296_v28 = vld [vmem:[%s2395_s14 + $0x40] sm:$0xff]  }
 0x124   : > { %v2568_v3 = vpack.c.bf16 %v681_v63, %v680_v62  ;;  %v682_v5 = vsel %vm650_vm12, %v2535_v51, %v666_v59  ;;  %v669_v7 = vmul.f32 0.01, %v2555_v61  ;;  %vm652_vm14 = vcmp.ge.f32.partialorder %v2546_v58, 0.0  ;;  %v2619_v31 = vld [vmem:[%s2787_s1 + $0x28] sm:$0xff]   ;;  %v2624_v32 = vld [vmem:[%s2787_s1 + $0x30] sm:$0xff]   ;;  %v2635_v35 = vld [vmem:[%s2787_s1 + $0x38] sm:$0xff]  }
 0x125   : > { %v683_v6 = vsel %vm651_vm13, %v2537_v52, %v667_v0  ;;  %vm653_vm15 = vcmp.ge.f32.partialorder %v2555_v61, 0.0  ;;  %v684_v10 = vsel %vm652_vm14, %v2546_v58, %v668_v1  ;;  %1970 = vmatpush3.bf16.msra.mxu0 %v2289_v4  ;;  %v2297_v33 = vld [vmem:[%s2395_s14 + $0x48] sm:$0xff]   ;;  %v2298_v34 = vld [vmem:[%s2395_s14 + $0x50] sm:$0xff]   ;;  %v2300_v38 = vld [vmem:[%s2395_s14 + $0x60] sm:$0xff]  }
 0x126   : > { %2004 = vmatpush3.bf16.msra.mxu1 %v2514_v44  ;;  %v692_v9 = vpack.c.bf16 %v683_v6, %v682_v5  ;;  %v685_v11 = vsel %vm653_vm15, %v2555_v61, %v669_v7  ;;  %1971 = vmatprep.subr.bf16.mxu0 %v2290_v8  ;;  %v2301_v39 = vld [vmem:[%s2395_s14 + $0x68] sm:$0xff]   ;;  %v2302_v41 = vld [vmem:[%s2395_s14 + $0x70] sm:$0xff]   ;;  %v2303_v42 = vld [vmem:[%s2395_s14 + $0x78] sm:$0xff]  }
 0x127   : > { %2005 = vmatprep.subr.bf16.mxu1 %v2540_v53  ;;  %v693_v13 = vpack.c.bf16 %v685_v11, %v684_v10  ;;  %v2305_v54 = vld [vmem:[%s2395_s14 + $0x88] sm:$0xff]   ;;  %v2306_v57 = vld [vmem:[%s2395_s14 + $0x90] sm:$0xff]  }
 0x129   : > { %1972 = vmatpush3.bf16.msra.mxu0 %v2290_v8 }
 0x12a   : > { %2006 = vmatpush3.bf16.msra.mxu1 %v2540_v53  ;;  %1973 = vmatprep.subr.bf16.mxu0 %v2291_v12 }
 0x12b   : > { %2007 = vmatprep.subr.bf16.mxu1 %v2553_v60 }
 0x12d   : > { %1974 = vmatpush3.bf16.msra.mxu0 %v2291_v12  ;;  %v2307_v12 = vld [vmem:[%s2395_s14 + $0x98] sm:$0xff]  }
 0x12e   : > { %2008 = vmatpush3.bf16.msra.mxu1 %v2553_v60  ;;  %1975 = vmatprep.subr.bf16.mxu0 %v2292_v14 }
 0x12f   : > { %2009 = vmatprep.subr.bf16.mxu1 %v2568_v3 }
 0x131   : > { %1976 = vmatpush3.bf16.msra.mxu0 %v2292_v14  ;;  %v2309_v14 = vld [vmem:[%s2395_s14 + $0xa8] sm:$0xff]  }
 0x132   : > { %2010 = vmatpush3.bf16.msra.mxu1 %v2568_v3  ;;  %1977 = vmatprep.subr.bf16.mxu0 %v2293_v20 }
 0x133   : > { %2011 = vmatprep.subr.bf16.mxu1 %v692_v9 }
 0x135   : > { %1978 = vmatpush3.bf16.msra.mxu0 %v2293_v20 }
 0x136   : > { %2012 = vmatpush3.bf16.msra.mxu1 %v692_v9  ;;  %1979 = vmatprep.subr.bf16.mxu0 %v2294_v21 }
 0x137   : > { %2013 = vmatprep.subr.bf16.mxu1 %v693_v13 }
 0x139   : > { %1980 = vmatpush3.bf16.msra.mxu0 %v2294_v21 }
 0x13a   : > { %2014 = vmatpush3.bf16.msra.mxu1 %v693_v13  ;;  %1981 = vmatprep.subr.bf16.mxu0 %v2295_v27 }
 0x13d   : > { %2016 = vmatmul.mubr.bf16.vlgmr.msra.gmra.mrb[0].mxu1 %v2591_v15  ;;  %1982 = vmatpush3.bf16.msra.mxu0 %v2295_v27 }
 0x13e   : > { %2019 = vmatprep.mubr.bf16.mxu1 %v2596_v17  ;;  %2031 = vmatprep.subr.bf16.mxu0 %v2296_v28 }
 0x140   : > { %1984 = vmatmul.mubr.bf16.vlgmr.msra.gmra.mrb[0].mxu0 %v2502_v37  ;;  %v2299_v37 = vld [vmem:[%s2395_s14 + $0x58] sm:$0xff]  }
 0x141   : > { %2032 = vmatpush3.bf16.msra.mxu0 %v2296_v28  ;;  %1987 = vmatprep.mubr.bf16.mxu0 %v2514_v44  ;;  %v2304_v44 = vld [vmem:[%s2395_s14 + $0x80] sm:$0xff]  }
 0x142   : > { %2033 = vmatprep.subr.bf16.mxu0 %v2297_v33 }
 0x145   : > { %2020 = vmatmul.mubr.bf16.gmra.mrb[4].mxu1 %v2605_v23  ;;  %2034 = vmatpush3.bf16.msra.mxu0 %v2297_v33 }
 0x146   : > { %2023 = vmatprep.mubr.bf16.mxu1 %v2610_v26  ;;  %2035 = vmatprep.subr.bf16.mxu0 %v2298_v34 }
 0x148   : > { %1988 = vmatmul.mubr.bf16.gmra.mrb[4].mxu0 %v2540_v53 }
 0x149   : > { %2036 = vmatpush3.bf16.msra.mxu0 %v2298_v34  ;;  %1991 = vmatprep.mubr.bf16.mxu0 %v2553_v60 }
 0x14a   : > { %2037 = vmatprep.subr.bf16.mxu0 %v2299_v37 }
 0x14d   : > { %2024 = vmatmul.mubr.bf16.gmra.mrb[8].mxu1 %v2619_v31  ;;  %2038 = vmatpush3.bf16.msra.mxu0 %v2299_v37 }
 0x14e   : > { %2027 = vmatprep.mubr.bf16.mxu1 %v2624_v32  ;;  %2039 = vmatprep.subr.bf16.mxu0 %v2300_v38 }
 0x150   : > { %1992 = vmatmul.mubr.bf16.gmra.mrb[8].mxu0 %v2568_v3 }
 0x151   : > { %2040 = vmatpush3.bf16.msra.mxu0 %v2300_v38  ;;  %1995 = vmatprep.mubr.bf16.mxu0 %v692_v9 }
 0x152   : > { %2041 = vmatprep.subr.bf16.mxu0 %v2301_v39 }
 0x155   : > { %2028 = vmatmul.mubr.bf16.gmra.mrb[12].mxu1 %v2635_v35  ;;  %2042 = vmatpush3.bf16.msra.mxu0 %v2301_v39 }
 0x156   : > { %2079 = vmatprep.mubr.bf16.mxu1 %v2521_v46  ;;  %2043 = vmatprep.subr.bf16.mxu0 %v2302_v41 }
 0x158   : > { %1996 = vmatmul.mubr.bf16.gmra.mrb[12].mxu0 %v693_v13  ;;  %v2308_v13 = vld [vmem:[%s2395_s14 + $0xa0] sm:$0xff]  }
 0x159   : > { %2044 = vmatpush3.bf16.msra.mxu0 %v2302_v41 }
 0x15a   : > { %2045 = vmatprep.subr.bf16.mxu0 %v2303_v42 }
 0x15d   : > { %2046 = vmatpush3.bf16.msra.mxu0 %v2303_v42 }
 0x15e   : > { %2095 = vmatprep.subr.bf16.mxu0 %v2304_v44 }
 0x210   : > { %v2017_v46 = vpop.f32.mrb[0].mxu1 }
 0x211   : > { %v944_v47 = vpop.f32.mrb[1].mxu1 }
 0x212   : > { %v2018_v48 = vpop.f32.mrb[2].mxu1 }
 0x213   : > { %v1008_v49 = vpack.c.bf16 %v2018_v48, %v2017_v46  ;;  %v947_v50 = vpop.f32.mrb[3].mxu1 }
 0x214   : > { %v1007_v53 = vpack.c.bf16 %v947_v50, %v944_v47 }
 0x216   : > { %2047 = vmatprep.mubr.bf16.mxu0 %v1007_v53  ;;  %2063 = vmatprep.subr.bf16.mxu1 %v1007_v53 }
 0x217   : > { %2048 = vmatmul.mubr.bf16.vlgmr.msra.gmra.mrb[0].mxu0 %v1008_v49  ;;  %2064 = vmatpush3.bf16.msra.mxu1 %v1007_v53 }
 0x218   : > { %v2021_v55 = vpop.f32.mrb[4].mxu1  ;;  %2065 = vmatprep.subr.bf16.mxu1 %v1008_v49  ;;  %2096 = vmatpush3.bf16.msra.mxu0 %v2304_v44 }
 0x219   : > { %v960_v56 = vpop.f32.mrb[5].mxu1  ;;  %2097 = vmatprep.subr.bf16.mxu0 %v2305_v54 }
 0x21a   : > { %v2022_v59 = vpop.f32.mrb[6].mxu1 }
 0x21b   : > { %v1010_v60 = vpack.c.bf16 %v2022_v59, %v2021_v55  ;;  %v963_v62 = vpop.f32.mrb[7].mxu1  ;;  %2066 = vmatpush3.bf16.msra.mxu1 %v1008_v49 }
 0x21c   : > { %v1009_v63 = vpack.c.bf16 %v963_v62, %v960_v56  ;;  %2098 = vmatpush3.bf16.msra.mxu0 %v2305_v54 }
 0x21d   : > { %2099 = vmatprep.subr.bf16.mxu0 %v2306_v57 }
 0x21e   : > { %2051 = vmatprep.mubr.bf16.mxu0 %v1009_v63  ;;  %2067 = vmatprep.subr.bf16.mxu1 %v1009_v63 }
 0x21f   : > { %2052 = vmatmul.mubr.bf16.gmra.mrb[4].mxu0 %v1010_v60  ;;  %2068 = vmatpush3.bf16.msra.mxu1 %v1009_v63 }
 0x220   : > { %v2025_v0 = vpop.f32.mrb[8].mxu1  ;;  %2069 = vmatprep.subr.bf16.mxu1 %v1010_v60  ;;  %2100 = vmatpush3.bf16.msra.mxu0 %v2306_v57 }
 0x221   : > { %v976_v1 = vpop.f32.mrb[9].mxu1  ;;  %2101 = vmatprep.subr.bf16.mxu0 %v2307_v12 }
 0x222   : > { %v2026_v2 = vpop.f32.mrb[10].mxu1 }
 0x223   : > { %v1012_v3 = vpack.c.bf16 %v2026_v2, %v2025_v0  ;;  %v979_v4 = vpop.f32.mrb[11].mxu1  ;;  %2070 = vmatpush3.bf16.msra.mxu1 %v1010_v60 }
 0x224   : > { %v1011_v5 = vpack.c.bf16 %v979_v4, %v976_v1  ;;  %2102 = vmatpush3.bf16.msra.mxu0 %v2307_v12  ;;  %v1778_v1 = vld [vmem:[%s304_s11] ss:$0 sm:$0xff] }
 0x225   : > { %2103 = vmatprep.subr.bf16.mxu0 %v2308_v13 }
 0x226   : > { %2055 = vmatprep.mubr.bf16.mxu0 %v1011_v5  ;;  %2071 = vmatprep.subr.bf16.mxu1 %v1011_v5 }
 0x227   : > { %2056 = vmatmul.mubr.bf16.gmra.mrb[8].mxu0 %v1012_v3  ;;  %2072 = vmatpush3.bf16.msra.mxu1 %v1011_v5 }
 0x228   : > { %v2029_v6 = vpop.f32.mrb[12].mxu1  ;;  %2073 = vmatprep.subr.bf16.mxu1 %v1012_v3  ;;  %2104 = vmatpush3.bf16.msra.mxu0 %v2308_v13 }
 0x229   : > { %v992_v7 = vpop.f32.mrb[13].mxu1  ;;  %2105 = vmatprep.subr.bf16.mxu0 %v2309_v14 }
 0x22a   : > { %v2030_v8 = vpop.f32.mrb[14].mxu1 }
 0x22b   : > { %v1014_v9 = vpack.c.bf16 %v2030_v8, %v2029_v6  ;;  %v995_v10 = vpop.f32.mrb[15].mxu1  ;;  %2074 = vmatpush3.bf16.msra.mxu1 %v1012_v3 }
 0x22c   : > { %v1013_v11 = vpack.c.bf16 %v995_v10, %v992_v7  ;;  %2106 = vmatpush3.bf16.msra.mxu0 %v2309_v14 }
 0x22e   : > { %2059 = vmatprep.mubr.bf16.mxu0 %v1013_v11  ;;  %2075 = vmatprep.subr.bf16.mxu1 %v1013_v11 }
 0x22f   : > { %2060 = vmatmul.mubr.bf16.gmra.mrb[12].mxu0 %v1014_v9  ;;  %2076 = vmatpush3.bf16.msra.mxu1 %v1013_v11 }
 0x230   : > { %2077 = vmatprep.subr.bf16.mxu1 %v1014_v9 }
 0x233   : > { %2078 = vmatpush3.bf16.msra.mxu1 %v1014_v9 }
 0x234   : > { %2175 = vmatprep.subr.bf16.mxu1 %v2304_v44 }
 0x236   : > { %2080 = vmatmul.mubr.bf16.vlgmr.msra.gmra.mrb[16].mxu1 %v2591_v15  ;;  %v2310_v15 = vld [vmem:[%s2395_s14 + $0xb0] sm:$0xff]  }
 0x237   : > { %2083 = vmatprep.mubr.bf16.mxu1 %v2596_v17  ;;  %2183 = vmatpush3.bf16.msra.mxu1 %v2304_v44  ;;  %v2311_v17 = vld [vmem:[%s2395_s14 + $0xb8] sm:$0xff]  }
 0x238   : > { %2176 = vmatprep.subr.bf16.mxu1 %v2305_v54  ;;  %2107 = vmatprep.subr.bf16.mxu0 %v2310_v15 }
 0x239   : > { %2108 = vmatpush3.bf16.msra.mxu0 %v2310_v15 }
 0x23a   : > { %2109 = vmatprep.subr.bf16.mxu0 %v2311_v17 }
 0x23b   : > { %2184 = vmatpush3.bf16.msra.mxu1 %v2305_v54 }
 0x23c   : > { %2177 = vmatprep.subr.bf16.mxu1 %v2306_v57 }
 0x23d   : > { %2110 = vmatpush3.bf16.msra.mxu0 %v2311_v17 }
 0x23e   : > { %2084 = vmatmul.mubr.bf16.gmra.mrb[20].mxu1 %v2605_v23 }
 0x23f   : > { %2087 = vmatprep.mubr.bf16.mxu1 %v2610_v26  ;;  %2185 = vmatpush3.bf16.msra.mxu1 %v2306_v57 }
 0x240   : > { %2178 = vmatprep.subr.bf16.mxu1 %v2307_v12 }
 0x243   : > { %2186 = vmatpush3.bf16.msra.mxu1 %v2307_v12 }
 0x244   : > { %2179 = vmatprep.subr.bf16.mxu1 %v2308_v13 }
 0x246   : > { %2088 = vmatmul.mubr.bf16.gmra.mrb[24].mxu1 %v2619_v31 }
 0x247   : > { %2091 = vmatprep.mubr.bf16.mxu1 %v2624_v32  ;;  %2187 = vmatpush3.bf16.msra.mxu1 %v2308_v13 }
 0x248   : > { %2180 = vmatprep.subr.bf16.mxu1 %v2309_v14 }
 0x24b   : > { %2188 = vmatpush3.bf16.msra.mxu1 %v2309_v14 }
 0x24c   : > { %2181 = vmatprep.subr.bf16.mxu1 %v2310_v15 }
 0x24e   : > { %2092 = vmatmul.mubr.bf16.gmra.mrb[28].mxu1 %v2635_v35 }
 0x24f   : > { %2189 = vmatpush3.bf16.msra.mxu1 %v2310_v15 }
 0x250   : > { %2182 = vmatprep.subr.bf16.mxu1 %v2311_v17 }
 0x253   : > { %2190 = vmatpush3.bf16.msra.mxu1 %v2311_v17 }
 0x2fa   : > { %v2662_v20 = vpop.f32.mrb[8].mxu0 }
 0x2fb   : > { %v2664_v21 = vpop.f32.mrb[9].mxu0 }
 0x2fc   : > { %v2666_v23 = vpop.f32.mrb[10].mxu0 }
 0x2fd   : > { %v2668_v26 = vpop.f32.mrb[11].mxu0 }
 0x302   : > { %v2670_v27 = vpop.f32.mrb[12].mxu0 }
 0x303   : > { %v2672_v28 = vpop.f32.mrb[13].mxu0 }
 0x304   : > { %v2674_v31 = vpop.f32.mrb[14].mxu0 }
 0x305   : > { %v2676_v32 = vpop.f32.mrb[15].mxu0 }
 0x309   : > { %v2081_v33 = vpop.f32.mrb[16].mxu1 }
 0x30a   : > { %v1226_v34 = vpop.f32.mrb[17].mxu1 }
 0x30b   : > { %v2082_v35 = vpop.f32.mrb[18].mxu1 }
 0x30c   : > { %v1290_v37 = vpack.c.bf16 %v2082_v35, %v2081_v33  ;;  %v1229_v38 = vpop.f32.mrb[19].mxu1 }
 0x30d   : > { %v1289_v39 = vpack.c.bf16 %v1229_v38, %v1226_v34 }
 0x30f   : > { %2111 = vmatprep.mubr.bf16.mxu0 %v1289_v39  ;;  %v2199_v39 = vadd.f32 %v2662_v20, %v1778_v1 }
 0x310   : > { %2112 = vmatmul.mubr.bf16.vlgmr.msra.gmra.mrb[0].mxu0 %v1290_v37 }
 0x311   : > { %v2085_v41 = vpop.f32.mrb[20].mxu1 }
 0x312   : > { %v1242_v42 = vpop.f32.mrb[21].mxu1 }
 0x313   : > { %v2086_v44 = vpop.f32.mrb[22].mxu1 }
 0x314   : > { %v1292_v46 = vpack.c.bf16 %v2086_v44, %v2085_v41  ;;  %v1245_v47 = vpop.f32.mrb[23].mxu1  ;;  %v2201_v41 = vadd.f32 %v1778_v1, %v2664_v21 }
 0x315   : > { %v1291_v48 = vpack.c.bf16 %v1245_v47, %v1242_v42 }
 0x317   : > { %2115 = vmatprep.mubr.bf16.mxu0 %v1291_v48 }
 0x318   : > { %2116 = vmatmul.mubr.bf16.gmra.mrb[4].mxu0 %v1292_v46 }
 0x319   : > { %v2089_v49 = vpop.f32.mrb[24].mxu1 }
 0x31a   : > { %v1258_v50 = vpop.f32.mrb[25].mxu1 }
 0x31b   : > { %v2090_v53 = vpop.f32.mrb[26].mxu1 }
 0x31c   : > { %v1294_v54 = vpack.c.bf16 %v2090_v53, %v2089_v49  ;;  %v1261_v55 = vpop.f32.mrb[27].mxu1 }
 0x31d   : > { %v1293_v56 = vpack.c.bf16 %v1261_v55, %v1258_v50 }
 0x31f   : > { %2119 = vmatprep.mubr.bf16.mxu1 %v1293_v56 }
 0x320   : > { %2120 = vmatmul.mubr.bf16.vlgmr.msra.gmra.mrb[32].mxu1 %v1294_v54 }
 0x321   : > { %v2093_v57 = vpop.f32.mrb[28].mxu1 }
 0x322   : > { %v1274_v59 = vpop.f32.mrb[29].mxu1 }
 0x323   : > { %v2094_v60 = vpop.f32.mrb[30].mxu1 }
 0x324   : > { %v1296_v62 = vpack.c.bf16 %v2094_v60, %v2093_v57  ;;  %v1277_v63 = vpop.f32.mrb[31].mxu1 }
 0x325   : > { %v1295_v0 = vpack.c.bf16 %v1277_v63, %v1274_v59 }
 0x327   : > { %2123 = vmatprep.mubr.bf16.mxu1 %v1295_v0 }
 0x328   : > { %2124 = vmatmul.mubr.bf16.gmra.mrb[36].mxu1 %v1296_v62 }
 0x3e3   : > { %v2113_v2 = vpop.f32.mrb[0].mxu0 }
 0x3e4   : > { %v2191_v3 = vadd.f32 %v2113_v2, %v1778_v1  ;;  %v1395_v4 = vpop.f32.mrb[1].mxu0 }
 0x3e5   : > { %v2192_v5 = vadd.f32 %v1778_v1, %v1395_v4  ;;  %v2114_v6 = vpop.f32.mrb[2].mxu0  ;;  %v2316_v4 = vld [vmem:[%s2792_s6 + $0x20] sm:$0xff] (!%p1811_p5)  }
 0x3e6   : > { %v1476_v7 = vadd.f32 %v2191_v3, %v2471_v19  ;;  %v2193_v8 = vadd.f32 %v2114_v6, %v1778_v1  ;;  %v1398_v9 = vpop.f32.mrb[3].mxu0  ;;  %v2318_v6 = vld [vmem:[%s2792_s6 + $0x30] sm:$0xff] (!%p1811_p5)  }
 0x3e7   : > { %v1474_v10 = vadd.f32 %v2192_v5, %v2467_v16  ;;  %v2194_v11 = vadd.f32 %v1778_v1, %v1398_v9  ;;  %v2317_v5 = vld [vmem:[%s2792_s6 + $0x28] sm:$0xff] (!%p1811_p5)  }
 0x3e8   : > { %1492 = vst [vmem:[#allocation2 + $0x10] sm:$0xff] %v1476_v7  ;;  %v1477_v12 = vadd.f32 %v2193_v8, %v2477_v22  ;;  %v2319_v7 = vld [vmem:[%s2792_s6 + $0x38] sm:$0xff] (!%p1811_p5)  }
 0x3e9   : > { %1490 = vst [vmem:[#allocation2] sm:$0xff] %v1474_v10  ;;  %v1475_v13 = vadd.f32 %v2194_v11, %v2469_v18 }
 0x3ea   : > { %1493 = vst [vmem:[#allocation2 + $0x18] sm:$0xff] %v1477_v12 }
 0x3eb   : > { %1491 = vst [vmem:[#allocation2 + $0x8] sm:$0xff] %v1475_v13  ;;  %v2117_v14 = vpop.f32.mrb[4].mxu0 }
 0x3ec   : > { %v2195_v15 = vadd.f32 %v2117_v14, %v1778_v1  ;;  %v1411_v17 = vpop.f32.mrb[5].mxu0 }
 0x3ed   : > { %v2196_v33 = vadd.f32 %v1778_v1, %v1411_v17  ;;  %v2118_v34 = vpop.f32.mrb[6].mxu0 }
 0x3ee   : > { %v1480_v19 = vadd.f32 %v2195_v15, %v2489_v29  ;;  %v2197_v35 = vadd.f32 %v2118_v34, %v1778_v1  ;;  %v1414_v37 = vpop.f32.mrb[7].mxu0  ;;  %v2203_v29 = vadd.f32 %v2666_v23, %v1778_v1  ;;  %v2207_v23 = vadd.f32 %v2670_v27, %v1778_v1 }
 0x3ef   : > { %v1478_v16 = vadd.f32 %v2196_v33, %v2481_v24  ;;  %v2198_v38 = vadd.f32 %v1778_v1, %v1414_v37  ;;  %v2205_v24 = vadd.f32 %v1778_v1, %v2668_v26  ;;  %v2209_v26 = vadd.f32 %v1778_v1, %v2672_v28  ;;  %v1512_v8 = vld [vmem:[#allocation2 + $0x10] sm:$0xff] (!%p1811_p5) }
 0x3f0   : > { %1496 = vst [vmem:[#allocation2 + $0x30] sm:$0xff] %v1480_v19  ;;  %v1481_v22 = vadd.f32 %v2197_v35, %v2491_v30 }
 0x3f1   : > { %1494 = vst [vmem:[#allocation2 + $0x20] sm:$0xff] %v1478_v16  ;;  %v1479_v18 = vadd.f32 %v2198_v38, %v2483_v25  ;;  %v1513_v9 = vld [vmem:[#allocation2 + $0x18] sm:$0xff] (!%p1811_p5) }
 0x3f2   : > { %1497 = vst [vmem:[#allocation2 + $0x38] sm:$0xff] %v1481_v22  ;;  %v1527_v17 = vpack.c.bf16 (!%p1811_p5), %v1513_v9, %v1512_v8 }
 0x3f3   : > { %1495 = vst [vmem:[#allocation2 + $0x28] sm:$0xff] %v1479_v18  ;;  %v2121_v42 = vpop.f32.mrb[32].mxu1 }
 0x3f4   : > { %v2200_v44 = vadd.f32 %v2199_v39, %v2121_v42  ;;  %v1427_v46 = vpop.f32.mrb[33].mxu1  ;;  %v1812_v39 = vld [vmem:[%s2793_s7] ss:$0 sm:$0xff] (!%p1811_p5) }
 0x3f5   : > { %v2202_v47 = vadd.f32 %v2201_v41, %v1427_v46  ;;  %v2122_v48 = vpop.f32.mrb[34].mxu1 }
 0x3f6   : > { %v1484_v30 = vadd.f32 %v2200_v44, %v2511_v43  ;;  %v2204_v49 = vadd.f32 %v2203_v29, %v2122_v48  ;;  %v1430_v50 = vpop.f32.mrb[35].mxu1  ;;  %v2211_v43 = vadd.f32 %v2674_v31, %v1778_v1  ;;  %v1510_v31 = vld [vmem:[#allocation2] sm:$0xff] (!%p1811_p5) }
 0x3f7   : > { %v1482_v25 = vadd.f32 %v2202_v47, %v2500_v36  ;;  %v2206_v20 = vadd.f32 %v2205_v24, %v1430_v50  ;;  %v2213_v36 = vadd.f32 %v1778_v1, %v2676_v32  ;;  %v1511_v32 = vld [vmem:[#allocation2 + $0x8] sm:$0xff] (!%p1811_p5)  ;;  %v1516_v35 = vld [vmem:[#allocation2 + $0x30] sm:$0xff] (!%p1811_p5) }
 0x3f8   : > { %1500 = vst [vmem:[#allocation2 + $0x50] sm:$0xff] %v1484_v30  ;;  %v1485_v21 = vadd.f32 %v2204_v49, %v2516_v45  ;;  %v1526_v1 = vpack.c.bf16 (!%p1811_p5), %v1511_v32, %v1510_v31  ;;  %v1514_v12 = vld [vmem:[#allocation2 + $0x20] sm:$0xff] (!%p1811_p5) }
 0x3f9   : > { %1498 = vst [vmem:[#allocation2 + $0x40] sm:$0xff] %v1482_v25  ;;  %v1483_v53 = vadd.f32 %v2206_v20, %v2507_v40  ;;  %v1517_v37 = vld [vmem:[#allocation2 + $0x38] sm:$0xff] (!%p1811_p5) }
 0x3fa   : > { %1501 = vst [vmem:[#allocation2 + $0x58] sm:$0xff] %v1485_v21  ;;  %2143 = vmatprep.mubr.bf16.mxu0 (!%p1811_p5), %v1526_v1  ;;  %v1515_v13 = vld [vmem:[#allocation2 + $0x28] sm:$0xff] (!%p1811_p5)  ;;  %v1529_v22 = vpack.c.bf16 (!%p1811_p5), %v1517_v37, %v1516_v35 }
 0x3fb   : > { %1499 = vst [vmem:[#allocation2 + $0x48] sm:$0xff] %v1483_v53  ;;  %v2125_v54 = vpop.f32.mrb[36].mxu1  ;;  %v1528_v34 = vpack.c.bf16 (!%p1811_p5), %v1515_v13, %v1514_v12 }
 0x3fc   : > { %v2208_v55 = vadd.f32 %v2207_v23, %v2125_v54  ;;  %v1443_v56 = vpop.f32.mrb[37].mxu1 }
 0x3fd   : > { %v2210_v57 = vadd.f32 %v2209_v26, %v1443_v56  ;;  %v2126_v59 = vpop.f32.mrb[38].mxu1  ;;  %1509 = sbr.rel (%p1811_p5) target bundleno = 1281 (0x501), region = 60 }
 0x3fe   : > { %v1488_v45 = vadd.f32 %v2208_v55, %v2546_v58  ;;  %v2212_v60 = vadd.f32 %v2211_v43, %v2126_v59  ;;  %v1446_v62 = vpop.f32.mrb[39].mxu1  ;;  %v2312_v58 = vld [vmem:[%s2792_s6] sm:$0xff] (!%p1811_p5)  }
 0x3ff   : > { %v1486_v40 = vadd.f32 %v2210_v57, %v2535_v51  ;;  %v2214_v27 = vadd.f32 %v2213_v36, %v1446_v62  ;;  %v2313_v51 = vld [vmem:[%s2792_s6 + $0x8] sm:$0xff] (!%p1811_p5)   ;;  %2127 = vmatprep.subr.bf16.mxu0 (!%p1811_p5), %v2312_v58  ;;  %2239 = vmatprep.subr.bf16.mxu1 (!%p1811_p5), %v2312_v58  ;;  %v1520_v10 = vld [vmem:[#allocation2 + $0x50] sm:$0xff] (!%p1811_p5) }
 0x400   : > { %1504 = vst [vmem:[#allocation2 + $0x70] sm:$0xff] %v1488_v45  ;;  %v1489_v28 = vadd.f32 %v2212_v60, %v2555_v61  ;;  %2128 = vmatpush3.bf16.msra.mxu0 (!%p1811_p5), %v2312_v58  ;;  %2247 = vmatpush3.bf16.msra.mxu1 (!%p1811_p5), %v2312_v58  ;;  %v2315_v61 = vld [vmem:[%s2792_s6 + $0x18] sm:$0xff] (!%p1811_p5)   ;;  %v1518_v0 = vld [vmem:[#allocation2 + $0x40] sm:$0xff] (!%p1811_p5) }
 0x401   : > { %1502 = vst [vmem:[#allocation2 + $0x60] sm:$0xff] %v1486_v40  ;;  %v1487_v63 = vadd.f32 %v2214_v27, %v2537_v52  ;;  %2129 = vmatprep.subr.bf16.mxu0 (!%p1811_p5), %v2313_v51  ;;  %2240 = vmatprep.subr.bf16.mxu1 (!%p1811_p5), %v2313_v51  ;;  %v2314_v52 = vld [vmem:[%s2792_s6 + $0x10] sm:$0xff] (!%p1811_p5)   ;;  %v1521_v11 = vld [vmem:[#allocation2 + $0x58] sm:$0xff] (!%p1811_p5) }
 0x402   : > { %1505 = vst [vmem:[#allocation2 + $0x78] sm:$0xff] %v1489_v28  ;;  %v1519_v2 = vld [vmem:[#allocation2 + $0x48] sm:$0xff] (!%p1811_p5)  ;;  %v1531_v33 = vpack.c.bf16 (!%p1811_p5), %v1521_v11, %v1520_v10 }
 0x403   : > { %1503 = vst [vmem:[#allocation2 + $0x68] sm:$0xff] %v1487_v63  ;;  %v1530_v3 = vpack.c.bf16 (!%p1811_p5), %v1519_v2, %v1518_v0 }
 0x404   : > { %2130 = vmatpush3.bf16.msra.mxu0 %v2313_v51  ;;  %2248 = vmatpush3.bf16.msra.mxu1 %v2313_v51 }
 0x405   : > { %2131 = vmatprep.subr.bf16.mxu0 %v2314_v52  ;;  %2241 = vmatprep.subr.bf16.mxu1 %v2314_v52 }
 0x406   : > { %2151 = vmatprep.mubr.bf16.mxu1 %v1530_v3 }
 0x407   : > { %v1524_v16 = vld [vmem:[#allocation2 + $0x70] sm:$0xff] }
 0x408   : > { %2132 = vmatpush3.bf16.msra.mxu0 %v2314_v52  ;;  %2249 = vmatpush3.bf16.msra.mxu1 %v2314_v52  ;;  %v1522_v14 = vld [vmem:[#allocation2 + $0x60] sm:$0xff] }
 0x409   : > { %2133 = vmatprep.subr.bf16.mxu0 %v2315_v61  ;;  %2242 = vmatprep.subr.bf16.mxu1 %v2315_v61  ;;  %v1525_v38 = vld [vmem:[#allocation2 + $0x78] sm:$0xff] }
 0x40a   : > { %v1523_v15 = vld [vmem:[#allocation2 + $0x68] sm:$0xff]  ;;  %v1533_v18 = vpack.c.bf16 %v1525_v38, %v1524_v16 }
 0x40b   : > { %v1532_v19 = vpack.c.bf16 %v1523_v15, %v1522_v14 }
 0x40c   : > { %2134 = vmatpush3.bf16.msra.mxu0 %v2315_v61  ;;  %2250 = vmatpush3.bf16.msra.mxu1 %v2315_v61 }
 0x40d   : > { %2135 = vmatprep.subr.bf16.mxu0 %v2316_v4  ;;  %2243 = vmatprep.subr.bf16.mxu1 %v2316_v4 }
 0x410   : > { %2136 = vmatpush3.bf16.msra.mxu0 %v2316_v4  ;;  %2251 = vmatpush3.bf16.msra.mxu1 %v2316_v4 }
 0x411   : > { %2137 = vmatprep.subr.bf16.mxu0 %v2317_v5  ;;  %2244 = vmatprep.subr.bf16.mxu1 %v2317_v5 }
 0x414   : > { %2138 = vmatpush3.bf16.msra.mxu0 %v2317_v5  ;;  %2252 = vmatpush3.bf16.msra.mxu1 %v2317_v5 }
 0x415   : > { %2139 = vmatprep.subr.bf16.mxu0 %v2318_v6  ;;  %2245 = vmatprep.subr.bf16.mxu1 %v2318_v6 }
 0x418   : > { %2140 = vmatpush3.bf16.msra.mxu0 %v2318_v6  ;;  %2253 = vmatpush3.bf16.msra.mxu1 %v2318_v6 }
 0x419   : > { %2141 = vmatprep.subr.bf16.mxu0 %v2319_v7  ;;  %2246 = vmatprep.subr.bf16.mxu1 %v2319_v7 }
 0x41c   : > { %2142 = vmatpush3.bf16.msra.mxu0 %v2319_v7  ;;  %2254 = vmatpush3.bf16.msra.mxu1 %v2319_v7 }
 0x41f   : > { %2144 = vmatmul.mubr.bf16.vlgmr.msra.gmra.mrb[0].mxu0 %v1527_v17  ;;  %2152 = vmatmul.mubr.bf16.vlgmr.msra.gmra.mrb[0].mxu1 %v1531_v33 }
 0x420   : > { %2147 = vmatprep.mubr.bf16.mxu0 %v1528_v34  ;;  %2155 = vmatprep.mubr.bf16.mxu1 %v1532_v19 }
 0x427   : > { %2148 = vmatmul.mubr.bf16.gmra.mrb[4].mxu0 %v1529_v22  ;;  %2156 = vmatmul.mubr.bf16.gmra.mrb[4].mxu1 %v1533_v18 }
 0x4f2   : > { %v2145_v41 = vpop.f32.mrb[0].mxu0  ;;  %v2153_v42 = vpop.f32.mrb[0].mxu1 }
 0x4f3   : > { %v1648_v29 = vadd.f32 %v2145_v41, %v1812_v39  ;;  %v1680_v44 = vadd.f32 %v2153_v42, %v1812_v39  ;;  %v1639_v46 = vpop.f32.mrb[1].mxu0  ;;  %v1671_v24 = vpop.f32.mrb[1].mxu1 }
 0x4f4   : > { %v1640_v47 = vadd.f32 %v1812_v39, %v1639_v46  ;;  %v1672_v48 = vadd.f32 %v1812_v39, %v1671_v24  ;;  %v2146_v30 = vpop.f32.mrb[2].mxu0  ;;  %v2154_v49 = vpop.f32.mrb[2].mxu1 }
 0x4f5   : > { %1704 = vst [vmem:[%s2794_s8 + $0x10] sm:$0xff] %v1648_v29  ;;  %1712 = vst [vmem:[%s2794_s8 + $0x50] sm:$0xff] %v1680_v44  ;;  %v1651_v50 = vadd.f32 %v2146_v30, %v1812_v39  ;;  %v1683_v25 = vadd.f32 %v2154_v49, %v1812_v39  ;;  %v1642_v20 = vpop.f32.mrb[3].mxu0  ;;  %v1674_v21 = vpop.f32.mrb[3].mxu1 }
 0x4f6   : > { %1702 = vst [vmem:[%s2794_s8] sm:$0xff] %v1640_v47  ;;  %1710 = vst [vmem:[%s2794_s8 + $0x40] sm:$0xff] %v1672_v48  ;;  %v1643_v53 = vadd.f32 %v1812_v39, %v1642_v20  ;;  %v1675_v23 = vadd.f32 %v1812_v39, %v1674_v21 }
 0x4f7   : > { %1705 = vst [vmem:[%s2794_s8 + $0x18] sm:$0xff] %v1651_v50  ;;  %1713 = vst [vmem:[%s2794_s8 + $0x58] sm:$0xff] %v1683_v25 }
 0x4f8   : > { %1703 = vst [vmem:[%s2794_s8 + $0x8] sm:$0xff] %v1643_v53  ;;  %1711 = vst [vmem:[%s2794_s8 + $0x48] sm:$0xff] %v1675_v23 }
 0x4fa   : > { %v2149_v26 = vpop.f32.mrb[4].mxu0  ;;  %v2157_v54 = vpop.f32.mrb[4].mxu1 }
 0x4fb   : > { %v1664_v43 = vadd.f32 %v2149_v26, %v1812_v39  ;;  %v1696_v55 = vadd.f32 %v2157_v54, %v1812_v39  ;;  %v1655_v56 = vpop.f32.mrb[5].mxu0  ;;  %v1687_v36 = vpop.f32.mrb[5].mxu1 }
 0x4fc   : > { %v1656_v57 = vadd.f32 %v1812_v39, %v1655_v56  ;;  %v1688_v59 = vadd.f32 %v1812_v39, %v1687_v36  ;;  %v2150_v45 = vpop.f32.mrb[6].mxu0  ;;  %v2158_v60 = vpop.f32.mrb[6].mxu1 }
 0x4fd   : > { %1708 = vst [vmem:[%s2794_s8 + $0x30] sm:$0xff] %v1664_v43  ;;  %1716 = vst [vmem:[%s2794_s8 + $0x70] sm:$0xff] %v1696_v55  ;;  %v1667_v62 = vadd.f32 %v2150_v45, %v1812_v39  ;;  %v1699_v40 = vadd.f32 %v2158_v60, %v1812_v39  ;;  %v1658_v27 = vpop.f32.mrb[7].mxu0  ;;  %v1690_v28 = vpop.f32.mrb[7].mxu1 }
 0x4fe   : > { %1706 = vst [vmem:[%s2794_s8 + $0x20] sm:$0xff] %v1656_v57  ;;  %1714 = vst [vmem:[%s2794_s8 + $0x60] sm:$0xff] %v1688_v59  ;;  %v1659_v63 = vadd.f32 %v1812_v39, %v1658_v27  ;;  %v1691_v58 = vadd.f32 %v1812_v39, %v1690_v28 }
 0x4ff   : > { %1709 = vst [vmem:[%s2794_s8 + $0x38] sm:$0xff] %v1667_v62  ;;  %1717 = vst [vmem:[%s2794_s8 + $0x78] sm:$0xff] %v1699_v40 }
 0x500   : > { %1707 = vst [vmem:[%s2794_s8 + $0x28] sm:$0xff] %v1659_v63  ;;  %1715 = vst [vmem:[%s2794_s8 + $0x68] sm:$0xff] %v1691_v58 }
 0x501 PF: > { %s18_s27 = sadd.s32 1, %s2326_s27  }
 0x502   : > { %p15_p6 = scmp.ge.s32.totalorder %s18_s27, 4  }
 0x504   :  { %17 = sbr.rel (!%p15_p6) target bundleno = 1 (0x1), region = 89 }

</bundles_post_ra>
